<compile_context>
chip_gen: v5e
topology: v5e:2x2
jax: 0.10.0
libtpu: 0.0.40
codegen_flags: <defaults>
</compile_context>

<pallas_src>
import jax
import jax.numpy as jnp
from jax.experimental import pallas as pl
from jax.experimental.pallas import tpu as pltpu


def _round_up(x, mult):
    return (x + mult - 1) // mult * mult


def _tpu_budgets():
    """(per-step tile budget, vmem_limit cap) for the current TPU generation."""
    try:
        cap = pltpu.get_tpu_info().vmem_capacity_bytes
    except Exception:
        cap = 128 << 20
    if cap <= (80 << 20):              # v7x: 64 MiB physical VMEM per TensorCore
        return 24 << 20, 48 << 20
    return 48 << 20, 96 << 20          # v5e / v6e: 128 MiB physical VMEM


def _choose_tm(m, per_row_bytes, tm_req, tile_budget):
    """Largest tile-M (multiple of 8) under budget, keeping >= 4 grid steps."""
    cap = max(8, (tile_budget // max(per_row_bytes, 1)) // 8 * 8)
    tm_eff = min(tm_req, cap)
    m8 = _round_up(m, 8)
    if m8 >= 32:
        # >= 4 grid steps: lets the "parallel" axis shard across TensorCores
        # and gives the double-buffer pipeline iterations to overlap.
        tm_eff = min(tm_eff, max(8, (m8 // 4) // 8 * 8))
    return max(8, min(tm_eff, m8))


def _matmul_bias_kernel(x_ref, w_ref, b_ref, out_ref):
    # One wide MXU matmul + fused bias epilogue, lane-dense store of the tile.
    out_ref[...] = (
        jnp.dot(x_ref[...], w_ref[...], preferred_element_type=jnp.float32)
        + b_ref[...]
    )


def _two_matmul_bias_kernel(x_ref, w1_ref, w2_ref, b_ref, out_ref):
    # Non-folded path (large cin): two MXU matmuls, bias fused once at the end.
    y = jnp.dot(x_ref[...], w1_ref[...], preferred_element_type=jnp.float32)
    out_ref[...] = (
        jnp.dot(y, w2_ref[...], preferred_element_type=jnp.float32) + b_ref[...]
    )


def _launch(kernel, x_flat, weight_args, weight_specs, n_eff, tm_req, flops,
            weight_bytes, inner_cols=0):
    """Run `kernel` over a 1-D parallel grid on rows of x_flat."""
    m, cin = x_flat.shape
    tile_budget, limit_cap = _tpu_budgets()

    # Per-row f32 bytes: double-buffered input + output tiles, plus (non-folded
    # path only) the intermediate y row.
    per_row = 2 * 4 * (cin + n_eff) + 4 * inner_cols
    tm_eff = _choose_tm(m, per_row, tm_req, tile_budget)
    m_pad = _round_up(m, tm_eff)
    if m_pad != m:
        x_flat = jnp.pad(x_flat, ((0, m_pad - m), (0, 0)))

    vmem_needed = (
        tm_eff * per_row          # double-buffered x/out tiles (+ intermediate y)
        + 2 * weight_bytes        # weight/bias operands are also double-buffered
        + (8 << 20)               # compiler-internal scratch headroom
    )
    vmem_limit = int(min(max(vmem_needed, 32 << 20), limit_cap))

    bytes_acc = 4 * (m_pad * cin + m_pad * n_eff) + weight_bytes

    out_flat = pl.pallas_call(
        kernel,
        out_shape=jax.ShapeDtypeStruct((m_pad, n_eff), jnp.float32),
        grid_spec=pltpu.PrefetchScalarGridSpec(
            num_scalar_prefetch=0,
            grid=(m_pad // tm_eff,),
            in_specs=[pl.BlockSpec((tm_eff, cin), lambda i: (i, 0))]
            + list(weight_specs),
            out_specs=pl.BlockSpec((tm_eff, n_eff), lambda i: (i, 0)),
        ),
        compiler_params=pltpu.CompilerParams(
            dimension_semantics=("parallel",),
            vmem_limit_bytes=vmem_limit,
        ),
        cost_estimate=pl.CostEstimate(
            flops=int(flops), transcendentals=0, bytes_accessed=int(bytes_acc)
        ),
    )(x_flat, *weight_args)
    return out_flat, m_pad


def _effective_lane_dim(n_out):
    """Pad the output lane dim to 128 only when the inflation is <= 25%."""
    n_pad = _round_up(n_out, 128)
    return n_pad if n_pad <= int(n_out * 1.25) else n_out


def onwards_layer(x, params, scale_factor, tm=512):
    """x: (N, Cin, H, W) float32, NCHW (PyTorch convention)."""
    n, cin, h, w = x.shape
    w1, b1 = params["w1"], params["b1"]                    # (Cout, Cin, 1, 1), (Cout,)
    cout = w1.shape[0]
    m = n * h * w

    # TODO(synk): the NCHW<->NHWC transpose round-trip could be removed if the
    # layer boundary accepted/emitted NHWC; kept to match the PyTorch interface.
    x_flat = jnp.transpose(x, (0, 2, 3, 1)).reshape(m, cin)
    w1_t = w1.reshape(cout, cin).T.astype(jnp.float32)      # (Cin, Cout)
    b1_r = b1.reshape(1, cout).astype(jnp.float32)

    if scale_factor > 1:
        s = int(scale_factor)
        w2, b2 = params["w2"], params["b2"]                 # (Cout, Cout, s, s), (Cout,)
        n_out = s * s * cout

        # Fused tap weight: column (kh*s+kw)*cout + p  <-  W2[co, p, kh, kw],
        # so the flat output reshapes directly to (n, h, w, kh, kw, cout).
        w2_flat = jnp.transpose(w2, (0, 2, 3, 1)).reshape(cout, n_out).astype(jnp.float32)
        # Fold b1 through the transposed conv + tile b2 over the s*s taps.
        b_fused = (jnp.dot(b1_r, w2_flat)
                   + jnp.tile(b2.reshape(1, cout).astype(jnp.float32), (1, s * s)))

        n_eff = _effective_lane_dim(n_out)
        if n_eff != n_out:
            w2_flat = jnp.pad(w2_flat, ((0, 0), (0, n_eff - n_out)))
            b_fused = jnp.pad(b_fused, ((0, 0), (0, n_eff - n_out)))

        # Fold the 1x1 conv into the ConvTranspose host-side when it does not
        # increase FLOPs: cin*(s^2-1) <= cout*s^2.
        fold = cin * (s * s - 1) <= cout * s * s
        if fold:
            w_fused = jnp.dot(w1_t, w2_flat, preferred_element_type=jnp.float32)
            out_flat, m_pad = _launch(
                _matmul_bias_kernel, x_flat,
                weight_args=[w_fused, b_fused],
                weight_specs=[
                    pl.BlockSpec((cin, n_eff), lambda i: (0, 0)),
                    pl.BlockSpec((1, n_eff), lambda i: (0, 0)),
                ],
                n_eff=n_eff, tm_req=tm,
                flops=2 * m * cin * n_out,
                weight_bytes=4 * (cin * n_eff + n_eff),
            )
        else:
            out_flat, m_pad = _launch(
                _two_matmul_bias_kernel, x_flat,
                weight_args=[w1_t, w2_flat, b_fused],
                weight_specs=[
                    pl.BlockSpec((cin, cout), lambda i: (0, 0)),
                    pl.BlockSpec((cout, n_eff), lambda i: (0, 0)),
                    pl.BlockSpec((1, n_eff), lambda i: (0, 0)),
                ],
                n_eff=n_eff, tm_req=tm,
                flops=2 * m * cin * cout + 2 * m * cout * n_out,
                weight_bytes=4 * (cin * cout + cout * n_eff + n_eff),
                inner_cols=cout,
            )

        if m_pad != m or n_eff != n_out:
            out_flat = out_flat[:m, :n_out]
        # (N*H*W, s*s*Cout) -> (N, H, W, kh, kw, Cout) -> (N, Cout, H*s, W*s)
        out = out_flat.reshape(n, h, w, s, s, cout)
        out = jnp.transpose(out, (0, 5, 1, 3, 2, 4)).reshape(n, cout, h * s, w * s)
        return out

    elif scale_factor == 1:
        n_eff = _effective_lane_dim(cout)
        w_p, b_p = w1_t, b1_r
        if n_eff != cout:
            w_p = jnp.pad(w1_t, ((0, 0), (0, n_eff - cout)))
            b_p = jnp.pad(b1_r, ((0, 0), (0, n_eff - cout)))

        out_flat, m_pad = _launch(
            _matmul_bias_kernel, x_flat,
            weight_args=[w_p, b_p],
            weight_specs=[
                pl.BlockSpec((cin, n_eff), lambda i: (0, 0)),
                pl.BlockSpec((1, n_eff), lambda i: (0, 0)),
            ],
            n_eff=n_eff, tm_req=tm,
            flops=2 * m * cin * cout,
            weight_bytes=4 * (cin * n_eff + n_eff),
        )
        if m_pad != m or n_eff != cout:
            out_flat = out_flat[:m, :cout]
        return jnp.transpose(out_flat.reshape(n, h, w, cout), (0, 3, 1, 2))

    else:
        # TODO(synk): scale_factor < 1 branch (Conv2d 3x3, padding=1, stride=1/sf)
        # not implemented.
        raise NotImplementedError("scale_factor < 1 not implemented")


def onwards_ref(x, params, scale_factor):
    """Pure-JAX reference with identical semantics (for self-check)."""
    cout = params["w1"].shape[0]
    w1 = params["w1"].reshape(cout, -1)
    y = jnp.einsum("nchw,oc->nohw", x, w1) + params["b1"][None, :, None, None]
    if scale_factor == 1:
        return y
    s = int(scale_factor)
    w2, b2 = params["w2"], params["b2"]
    z = jnp.einsum("nohw,opkl->nphkwl", y, w2)
    n, p, H, _, W, _ = z.shape
    return z.reshape(n, p, H * s, W * s) + b2[None, :, None, None]


if __name__ == "__main__":
    N, CIN, H, W = 2, 4, 16, 16
    COUT, SCALE = 8, 2

    key = jax.random.PRNGKey(0)
    kx, k1, k2, k3, k4 = jax.random.split(key, 5)
    x = jax.random.normal(kx, (N, CIN, H, W), jnp.float32)
    params = {
        "w1": 0.1 * jax.random.normal(k1, (COUT, CIN, 1, 1), jnp.float32),
        "b1": 0.1 * jax.random.normal(k2, (COUT,), jnp.float32),
        "w2": 0.1 * jax.random.normal(k3, (COUT, COUT, SCALE, SCALE), jnp.float32),
        "b2": 0.1 * jax.random.normal(k4, (COUT,), jnp.float32),
    }

    # scale_factor > 1 path (Conv1x1 + ConvTranspose2d folded into one matmul)
    out = jax.block_until_ready(onwards_layer(x, params, SCALE))
    ref = onwards_ref(x, params, SCALE)
    assert out.shape == (N, COUT, H * SCALE, W * SCALE), out.shape
    assert jnp.allclose(out, ref, atol=1e-5, rtol=1e-5), "mismatch vs reference (s>1)"

    # scale_factor == 1 path (Conv1x1 + Identity)
    out1 = jax.block_until_ready(onwards_layer(x, params, 1))
    ref1 = onwards_ref(x, params, 1)
    assert out1.shape == (N, COUT, H, W), out1.shape
    assert jnp.allclose(out1, ref1, atol=1e-5, rtol=1e-5), "mismatch vs reference (s=1)"

    print("KERNEL_OK")
</pallas_src>

<mosaic_0001>
module attributes {stable_mosaic.version = 11 : i64} {
  func.func @_matmul_bias_kernel(%arg0: i32, %arg1: memref<128x4xf32, #tpu.memory_space<vmem>>, %arg2: memref<4x32xf32, #tpu.memory_space<vmem>>, %arg3: memref<1x32xf32, #tpu.memory_space<vmem>>, %arg4: memref<128x32xf32, #tpu.memory_space<vmem>>) attributes {dimension_semantics = [#tpu.dimension_semantics<parallel>], iteration_bounds = array<i64: 4>, scalar_prefetch = 0 : i64, scratch_operands = 0 : i64, tpu.core_type = #tpu.core_type<tc>, window_params = [{transform_indices = @transform_0, window_bounds = array<i64: 128, 4>}, {pipeline_mode = #tpu.pipeline_mode<synchronous>, transform_indices = @transform_1, window_bounds = array<i64: 4, 32>}, {pipeline_mode = #tpu.pipeline_mode<synchronous>, transform_indices = @transform_2, window_bounds = array<i64: 1, 32>}, {transform_indices = @transform_3, window_bounds = array<i64: 128, 32>}]} {
    %c0 = arith.constant 0 : index
    %c0_0 = arith.constant 0 : index
    %0 = vector.load %arg1[%c0, %c0_0] : memref<128x4xf32, #tpu.memory_space<vmem>>, vector<128x4xf32>
    %c0_1 = arith.constant 0 : index
    %c0_2 = arith.constant 0 : index
    %1 = vector.load %arg2[%c0_1, %c0_2] : memref<4x32xf32, #tpu.memory_space<vmem>>, vector<4x32xf32>
    %cst = arith.constant dense<0.000000e+00> : vector<128x32xf32>
    %2 = tpu.matmul %0, %1, %cst {dimension_numbers = #tpu.dot_dimension_numbers<[1], [0], [0], [1], [0, 0, 1, 1], [], []>} : vector<128x4xf32>, vector<4x32xf32>, vector<128x32xf32> -> vector<128x32xf32>
    %c0_3 = arith.constant 0 : index
    %c0_4 = arith.constant 0 : index
    %3 = vector.load %arg3[%c0_3, %c0_4] : memref<1x32xf32, #tpu.memory_space<vmem>>, vector<1x32xf32>
    %4 = vector.broadcast %3 : vector<1x32xf32> to vector<128x32xf32>
    %5 = arith.addf %2, %4 : vector<128x32xf32>
    %c0_5 = arith.constant 0 : index
    %c0_6 = arith.constant 0 : index
    %6 = vector.load %arg4[%c0_5, %c0_6] : memref<128x32xf32, #tpu.memory_space<vmem>>, vector<128x32xf32>
    tpu.vector_store %arg4[%c0_5, %c0_6], %5 {strides = array<i32>} : memref<128x32xf32, #tpu.memory_space<vmem>>, vector<128x32xf32>,
    return
  }
  func.func @transform_0(%arg0: i32) -> (i32, i32) {
    %c0_i32 = arith.constant 0 : i32
    %c0_i32_0 = arith.constant 0 : i32
    return %arg0, %c0_i32 : i32, i32
  }
  func.func @transform_1(%arg0: i32) -> (i32, i32) {
    %c0_i32 = arith.constant 0 : i32
    %c0_i32_0 = arith.constant 0 : i32
    %c0_i32_1 = arith.constant 0 : i32
    return %c0_i32, %c0_i32_0 : i32, i32
  }
  func.func @transform_2(%arg0: i32) -> (i32, i32) {
    %c0_i32 = arith.constant 0 : i32
    %c0_i32_0 = arith.constant 0 : i32
    %c0_i32_1 = arith.constant 0 : i32
    return %c0_i32, %c0_i32_0 : i32, i32
  }
  func.func @transform_3(%arg0: i32) -> (i32, i32) {
    %c0_i32 = arith.constant 0 : i32
    %c0_i32_0 = arith.constant 0 : i32
    return %arg0, %c0_i32 : i32, i32
  }
}

</mosaic_0001>

<bundles_post_ra>
// kernel: tpu_custom_call.1
= control target key start
LH: loop header
LB: loop body
LE: loop exit
PB: predicated region body
PF: predicated region fallthrough
CT: control target
= control target key end

     0   :  { %s454_s12 = smov 0   ;;  %s534_s0 = inlined_call_operand.vmem [shape: f32[512,4], index: 0, kind: input, shape index: {}]   ;;  %s535_s1 = inlined_call_operand.vmem [shape: f32[4,32], index: 1, kind: input, shape index: {}]   ;;  %s536_s2 = inlined_call_operand.vmem [shape: f32[1,32], index: 2, kind: input, shape index: {}]   ;;  %s537_s3 = inlined_call_operand.vmem [shape: f32[512,32], index: 3, kind: output, shape index: {}]  }
   0x1 LB: > { %s386_s13 = sadd.s32 4294967295, %s432_s12   ;;  %p390_p0 = scmp.ge.s32.totalorder %s432_s12, 1  ;;  %s432_s12 = sphi %s454_s12, %s13_s12  }
   0x2   : > { %p138_p1 = scmp.lt.s32.totalorder %s432_s12, 5 }
   0x4   : > { %p139_p2 = pnand %p390_p0, %p138_p1 }
   0x5   : > { %s391_s16 = sshll.u32 (!%p139_p2), %s386_s13, 4 }
   0x6   : > { %142 = sbr.rel (%p139_p2) target bundleno = 175 (0xaf), region = 32  ;;  %p163_p3 = scmp.lt.s32.totalorder (!%p139_p2), %s391_s16, 63 }
   0xb   : > { %v190_v0 = vld [vmem:[%s535_s1] sm:$0xf]  ;;  %vm244_vm0 = vcmask 1043456   ;;  %s539_s16 = smov (!%p163_p3, %s391_s16), 63  ;;  %vm195_vm1 = vcmask 31744   ;;  %vm313_vm2 = vcmask 261120  }
   0xc   : > { %415 = vmatpush.msk.msra.mxu2 %vm244_vm0, %v190_v0  ;;  %416 = vmatpush.msk.msra.mxu3 %vm244_vm0, %v190_v0  ;;  %s392_s17 = sshll.u32 %s539_s16, 3  ;;  %v425_v17 = vld [vmem:[%s536_s2] ss:$0 sm:$0xff] }
   0xd   : > { %395 = vmatpush.msk.msra.mxu0 %vm244_vm0, %v190_v0  ;;  %414 = vmatpush.msk.msra.mxu1 %vm244_vm0, %v190_v0  ;;  %s166_s20 = scalar_lea.vmem %s534_s0, %s392_s17  ;;  %s497_s25 = scalar_lea.vmem %s537_s3, %s392_s17 }
   0xe   : > { %v182_v1 = vld [vmem:[%s166_s20 + $0x40] sm:$0xff]  ;;  %v183_v5 = vld [vmem:[%s166_s20 + $0x48] sm:$0xff]  ;;  %v184_v9 = vld [vmem:[%s166_s20 + $0x50] sm:$0xff] }
   0xf   : > { %v186_v2 = vld [vmem:[%s166_s20 + $0x60] sm:$0xff]  ;;  %404 = vmatmul.msk.f32.vlgmr.msra.gmra.mxu2 %vm195_vm1, %v182_v1  ;;  %v187_v6 = vld [vmem:[%s166_s20 + $0x68] sm:$0xff]  ;;  %v188_v10 = vld [vmem:[%s166_s20 + $0x70] sm:$0xff] }
  0x10   : > { %v174_v3 = vld [vmem:[%s166_s20] sm:$0xff]  ;;  %408 = vmatmul.msk.f32.vlgmr.msra.gmra.mxu3 %vm195_vm1, %v186_v2  ;;  %v175_v7 = vld [vmem:[%s166_s20 + $0x8] sm:$0xff]  ;;  %v176_v11 = vld [vmem:[%s166_s20 + $0x10] sm:$0xff] }
  0x11   : > { %v178_v4 = vld [vmem:[%s166_s20 + $0x20] sm:$0xff]  ;;  %396 = vmatmul.msk.f32.vlgmr.msra.gmra.mxu0 %vm195_vm1, %v174_v3  ;;  %v179_v8 = vld [vmem:[%s166_s20 + $0x28] sm:$0xff]  ;;  %v180_v12 = vld [vmem:[%s166_s20 + $0x30] sm:$0xff] }
  0x12   : > { %400 = vmatmul.msk.f32.vlgmr.msra.gmra.mxu1 %vm195_vm1, %v178_v4  ;;  %v185_v13 = vld [vmem:[%s166_s20 + $0x58] sm:$0xff] }
  0x13   : > { %v189_v14 = vld [vmem:[%s166_s20 + $0x78] sm:$0xff] }
  0x14   : > { %v177_v15 = vld [vmem:[%s166_s20 + $0x18] sm:$0xff] }
  0x15   : > { %v181_v16 = vld [vmem:[%s166_s20 + $0x38] sm:$0xff] }
  0x17   : > { %405 = vmatmul.msk.f32.gmra.mxu2 %vm195_vm1, %v183_v5 }
  0x18   : > { %409 = vmatmul.msk.f32.gmra.mxu3 %vm195_vm1, %v187_v6 }
  0x19   : > { %397 = vmatmul.msk.f32.gmra.mxu0 %vm195_vm1, %v175_v7 }
  0x1a   : > { %401 = vmatmul.msk.f32.gmra.mxu1 %vm195_vm1, %v179_v8 }
  0x1f   : > { %406 = vmatmul.msk.f32.gmra.mxu2 %vm195_vm1, %v184_v9 }
  0x20   : > { %410 = vmatmul.msk.f32.gmra.mxu3 %vm195_vm1, %v188_v10 }
  0x21   : > { %398 = vmatmul.msk.f32.gmra.mxu0 %vm195_vm1, %v176_v11 }
  0x22   : > { %402 = vmatmul.msk.f32.gmra.mxu1 %vm195_vm1, %v180_v12 }
  0x27   : > { %407 = vmatmul.msk.f32.gmra.mxu2 %vm195_vm1, %v185_v13 }
  0x28   : > { %411 = vmatmul.msk.f32.gmra.mxu3 %vm195_vm1, %v189_v14 }
  0x29   : > { %399 = vmatmul.msk.f32.gmra.mxu0 %vm195_vm1, %v177_v15 }
  0x2a   : > { %403 = vmatmul.msk.f32.gmra.mxu1 %vm195_vm1, %v181_v16 }
  0x8e   : > { %v265_v18 = vpop.f32.mrf.mxu0 }
  0x8f   : > { %v277_v19 = vpop.f32.mrf.mxu1  ;;  %v266_v20 = vadd.f32 %v425_v17, %v265_v18 }
  0x90   : > { %v278_v21 = vadd.f32 %v425_v17, %v277_v19 }
  0x91   : > { %314 = vst.msk [vmem:[%s497_s25] sm:$0xff] %vm313_vm2, %v266_v20 }
  0x92   : > { %318 = vst.msk [vmem:[%s497_s25 + $0x20] sm:$0xff] %vm313_vm2, %v278_v21  ;;  %v289_v22 = vpop.f32.mrf.mxu2 }
  0x93   : > { %v301_v23 = vpop.f32.mrf.mxu3  ;;  %v290_v24 = vadd.f32 %v425_v17, %v289_v22 }
  0x94   : > { %v302_v25 = vadd.f32 %v425_v17, %v301_v23 }
  0x95   : > { %322 = vst.msk [vmem:[%s497_s25 + $0x40] sm:$0xff] %vm313_vm2, %v290_v24 }
  0x96   : > { %v268_v26 = vpop.f32.mrf.mxu0  ;;  %326 = vst.msk [vmem:[%s497_s25 + $0x60] sm:$0xff] %vm313_vm2, %v302_v25 }
  0x97   : > { %v280_v27 = vpop.f32.mrf.mxu1  ;;  %v269_v28 = vadd.f32 %v425_v17, %v268_v26 }
  0x98   : > { %v281_v29 = vadd.f32 %v425_v17, %v280_v27 }
  0x99   : > { %315 = vst.msk [vmem:[%s497_s25 + $0x8] sm:$0xff] %vm313_vm2, %v269_v28 }
  0x9a   : > { %319 = vst.msk [vmem:[%s497_s25 + $0x28] sm:$0xff] %vm313_vm2, %v281_v29  ;;  %v292_v30 = vpop.f32.mrf.mxu2 }
  0x9b   : > { %v304_v31 = vpop.f32.mrf.mxu3  ;;  %v293_v32 = vadd.f32 %v425_v17, %v292_v30 }
  0x9c   : > { %v305_v33 = vadd.f32 %v425_v17, %v304_v31 }
  0x9d   : > { %323 = vst.msk [vmem:[%s497_s25 + $0x48] sm:$0xff] %vm313_vm2, %v293_v32 }
  0x9e   : > { %v271_v34 = vpop.f32.mrf.mxu0  ;;  %327 = vst.msk [vmem:[%s497_s25 + $0x68] sm:$0xff] %vm313_vm2, %v305_v33 }
  0x9f   : > { %v283_v35 = vpop.f32.mrf.mxu1  ;;  %v272_v36 = vadd.f32 %v425_v17, %v271_v34 }
  0xa0   : > { %v284_v37 = vadd.f32 %v425_v17, %v283_v35 }
  0xa1   : > { %316 = vst.msk [vmem:[%s497_s25 + $0x10] sm:$0xff] %vm313_vm2, %v272_v36 }
  0xa2   : > { %320 = vst.msk [vmem:[%s497_s25 + $0x30] sm:$0xff] %vm313_vm2, %v284_v37  ;;  %v295_v38 = vpop.f32.mrf.mxu2 }
  0xa3   : > { %v307_v39 = vpop.f32.mrf.mxu3  ;;  %v296_v40 = vadd.f32 %v425_v17, %v295_v38 }
  0xa4   : > { %v308_v41 = vadd.f32 %v425_v17, %v307_v39 }
  0xa5   : > { %324 = vst.msk [vmem:[%s497_s25 + $0x50] sm:$0xff] %vm313_vm2, %v296_v40 }
  0xa6   : > { %v274_v42 = vpop.f32.mrf.mxu0  ;;  %328 = vst.msk [vmem:[%s497_s25 + $0x70] sm:$0xff] %vm313_vm2, %v308_v41 }
  0xa7   : > { %v286_v43 = vpop.f32.mrf.mxu1  ;;  %v275_v44 = vadd.f32 %v425_v17, %v274_v42 }
  0xa8   : > { %v287_v45 = vadd.f32 %v425_v17, %v286_v43 }
  0xa9   : > { %317 = vst.msk [vmem:[%s497_s25 + $0x18] sm:$0xff] %vm313_vm2, %v275_v44 }
  0xaa   : > { %321 = vst.msk [vmem:[%s497_s25 + $0x38] sm:$0xff] %vm313_vm2, %v287_v45  ;;  %v298_v46 = vpop.f32.mrf.mxu2 }
  0xab   : > { %v310_v47 = vpop.f32.mrf.mxu3  ;;  %v299_v48 = vadd.f32 %v425_v17, %v298_v46 }
  0xac   : > { %v311_v49 = vadd.f32 %v425_v17, %v310_v47 }
  0xad   : > { %325 = vst.msk [vmem:[%s497_s25 + $0x58] sm:$0xff] %vm313_vm2, %v299_v48 }
  0xae   : > { %329 = vst.msk [vmem:[%s497_s25 + $0x78] sm:$0xff] %vm313_vm2, %v311_v49 }
  0xaf PF: > { %s13_s12 = sadd.s32 1, %s432_s12  }
  0xb0   : > { %p10_p4 = scmp.ge.s32.totalorder %s13_s12, 6  }
  0xb2   :  { %12 = sbr.rel (!%p10_p4) target bundleno = 1 (0x1), region = 62 }

</bundles_post_ra>
